<compile_context>
chip_gen: v6e
topology: v6e:2x2x1
jax: 0.10.0
libtpu: 0.0.40
codegen_flags: <defaults>
</compile_context>

<pallas_src>
import math
import functools

import jax
import jax.numpy as jnp
from jax import lax
from jax.experimental import pallas as pl
from jax.experimental.pallas import tpu as pltpu


def _vmem_limit_bytes():
    # v5e/v6e have 128 MiB physical VMEM (raise the 32 MiB scoped default);
    # v7x only has 64 MiB, so stay well below it.
    try:
        cap = pltpu.get_tpu_info().vmem_capacity_bytes
    except Exception:
        cap = 128 * 1024 * 1024
    return int(min(96 * 1024 * 1024, cap * 3 // 4))


def _pick_row_tile(dim, cap=512):
    """Largest divisor of `dim` that is a multiple of 8 and <= cap, else dim."""
    best = None
    t = 8
    while t <= min(dim, cap):
        if dim % t == 0:
            best = t
        t += 8
    return best if best is not None else dim


def _pick_col_tile(dim, cap=512):
    """Largest divisor of `dim` that is a multiple of 128 and <= cap, else dim."""
    best = None
    t = 128
    while t <= min(dim, cap):
        if dim % t == 0:
            best = t
        t += 128
    return best if best is not None else dim


def _num_head_groups(num_heads, head_dim):
    """Split heads into grid groups whose lane width is a multiple of 128
    (lane-dense, legal blocks); prefer widths <= 256 for extra grid
    parallelism (v7x megacore). Falls back to a single group (width = E)."""
    first_aligned = None
    for g in range(1, num_heads + 1):
        if num_heads % g:
            continue
        w = (num_heads // g) * head_dim
        if w % 128 == 0:
            if first_aligned is None:
                first_aligned = g
            if w <= 256:
                return g
    return first_aligned if first_aligned is not None else 1


# ----------------------------------------------------------------------------
# Tiled linear projection:  y = x @ w_t + b   (w_t pre-transposed (in, out))
# ----------------------------------------------------------------------------
def _linear_kernel(x_ref, w_ref, b_ref, o_ref):
    # bf16 MXU matmul with f32 accumulation, bias added in f32.
    acc = jnp.dot(x_ref[...].astype(jnp.bfloat16),
                  w_ref[...].astype(jnp.bfloat16),
                  preferred_element_type=jnp.float32)
    o_ref[...] = (acc + b_ref[...]).astype(o_ref.dtype)


def linear(x, w_t, b):
    """x: (M, K) @ w_t: (K, N) + b: (N,) -> (M, N).

    Grid = (N-tiles, M-tiles): the (K, tn) weight panel depends only on the
    OUTER axis, so it stays resident in VMEM across the whole inner M loop
    (weight HBM traffic ~1x; the x panel is re-read N/tn times instead).
    """
    M, K = x.shape
    N = w_t.shape[1]
    tm = _pick_row_tile(M)
    tn = _pick_col_tile(N)
    grid = (N // tn, M // tm)
    # TODO(synk): add a K-axis grid ("arbitrary") with a (tm, tn) f32 VMEM
    # accumulator (and remainder handling) for very large K on v7x's 64 MiB VMEM.
    return pl.pallas_call(
        _linear_kernel,
        out_shape=jax.ShapeDtypeStruct((M, N), x.dtype),
        grid=grid,
        in_specs=[
            pl.BlockSpec((tm, K), lambda j, i: (i, 0)),
            pl.BlockSpec((K, tn), lambda j, i: (0, j)),   # resident across i
            pl.BlockSpec((1, tn), lambda j, i: (0, j)),
        ],
        out_specs=pl.BlockSpec((tm, tn), lambda j, i: (i, j)),
        compiler_params=pltpu.CompilerParams(
            dimension_semantics=("parallel", "parallel"),
            vmem_limit_bytes=_vmem_limit_bytes()),
    )(x, w_t, b.reshape(1, N))


# ----------------------------------------------------------------------------
# Cosformer linear-attention kernel (non-causal, relu feature map)
# ----------------------------------------------------------------------------
def _cosformer_attn_kernel(q_ref, k_ref, v_ref, o_ref,
                           kv_sin_ref, kv_cos_ref, ksum_sin_ref, ksum_cos_ref,
                           *, heads, head_dim, tgt_len, s_tile, m_len,
                           constant, eps):
    # q_ref: (L, 1, 1, W); k_ref/v_ref: (ts, 1, 1, W); o_ref: (L, 1, 1, W)
    # with W = heads * head_dim (lane-dense per-group width).
    st = pl.program_id(2)
    ang_scale = (math.pi / 2.0) * float(constant) / float(m_len)

    @pl.when(st == 0)
    def _init():
        kv_sin_ref[...] = jnp.zeros_like(kv_sin_ref)
        kv_cos_ref[...] = jnp.zeros_like(kv_cos_ref)
        ksum_sin_ref[...] = jnp.zeros_like(ksum_sin_ref)
        ksum_cos_ref[...] = jnp.zeros_like(ksum_cos_ref)

    # ---- accumulate this S tile into kv / ksum ------------------------------
    # relu + sin/cos reweighting applied ONCE on the full (ts, W) tile (VPU/EUP).
    pos_s = (lax.broadcasted_iota(jnp.int32, (s_tile, 1), 0)
             + st * s_tile + 1).astype(jnp.float32)
    sin_s = jnp.sin(pos_s * ang_scale)
    cos_s = jnp.cos(pos_s * ang_scale)

    k_blk = jnp.maximum(k_ref[:, 0, 0, :], 0.0)            # (ts, W)
    v_blk = v_ref[:, 0, 0, :]                              # (ts, W)
    k_sin = k_blk * sin_s
    k_cos = k_blk * cos_s
    ksum_sin_ref[...] += jnp.sum(k_sin, axis=0, keepdims=True)
    ksum_cos_ref[...] += jnp.sum(k_cos, axis=0, keepdims=True)

    k_sin_b = k_sin.astype(jnp.bfloat16)
    k_cos_b = k_cos.astype(jnp.bfloat16)
    v_b = v_blk.astype(jnp.bfloat16)
    # Contract the row (S) axis of both operands: no materialized k^T, and the
    # split sin/cos streams avoid the previous per-head lane concatenation.
    dn = (((0,), (0,)), ((), ()))
    # TODO(synk): for very large head counts, switch to lax.fori_loop with
    # dynamic lane slices to bound live ranges; static unroll is fine for H<=16.
    for h in range(heads):
        cols = slice(h * head_dim, (h + 1) * head_dim)
        kv_sin_ref[h] += lax.dot_general(k_sin_b[:, cols], v_b[:, cols], dn,
                                         preferred_element_type=jnp.float32)
        kv_cos_ref[h] += lax.dot_general(k_cos_b[:, cols], v_b[:, cols], dn,
                                         preferred_element_type=jnp.float32)

    # ---- finalize on the last S tile ----------------------------------------
    @pl.when(st == pl.num_programs(2) - 1)
    def _finalize():
        pos_l = (lax.broadcasted_iota(jnp.int32, (tgt_len, 1), 0) + 1
                 ).astype(jnp.float32)
        sin_l = jnp.sin(pos_l * ang_scale)
        cos_l = jnp.cos(pos_l * ang_scale)
        q_blk = jnp.maximum(q_ref[:, 0, 0, :], 0.0)        # (L, W)
        q_sin = q_blk * sin_l
        q_cos = q_blk * cos_l
        # Per-head denominator terms from one full-width VPU pass.
        d_full = q_sin * ksum_sin_ref[...] + q_cos * ksum_cos_ref[...]  # (L, W)
        q_sin_b = q_sin.astype(jnp.bfloat16)
        q_cos_b = q_cos.astype(jnp.bfloat16)
        outs = []
        for h in range(heads):
            cols = slice(h * head_dim, (h + 1) * head_dim)
            num = (jnp.dot(q_sin_b[:, cols], kv_sin_ref[h].astype(jnp.bfloat16),
                           preferred_element_type=jnp.float32)
                   + jnp.dot(q_cos_b[:, cols], kv_cos_ref[h].astype(jnp.bfloat16),
                             preferred_element_type=jnp.float32))
            denom = jnp.sum(d_full[:, cols], axis=-1, keepdims=True)   # (L, 1)
            z = pl.reciprocal(jnp.maximum(denom, eps), approx=True)    # EUP
            outs.append(num * z)
        full = outs[0] if heads == 1 else jnp.concatenate(outs, axis=-1)
        o_ref[:, 0, 0, :] = full.astype(o_ref.dtype)       # single full-width store


def cosformer_attention_core(q, k, v, slots, packs, batch, num_heads, head_dim,
                             *, constant, eps):
    """q: (L, B*pq*G, 1, Wg); k/v: (S, B*pk*G, 1, Wg), Wg = (H/G)*Dh.

    Grid = (batch, head-group, S-tile) with dimension_semantics
    ("parallel", "parallel", "arbitrary"). kv/ksum live in f32 VMEM scratch
    across the S axis; the (L, Wg) lane-dense output is written once at the
    last S step.
    """
    L = q.shape[0]
    S = k.shape[0]
    Wg = q.shape[-1]
    B = batch
    H, Dh = num_heads, head_dim
    G = (H * Dh) // Wg
    Hg = H // G
    pq, pk, pv = packs
    sq, sk, sv = slots
    ts = _pick_row_tile(S, cap=512)
    n_st = S // ts
    m_len = max(L, S)

    kernel = functools.partial(
        _cosformer_attn_kernel, heads=Hg, head_dim=Dh, tgt_len=L, s_tile=ts,
        m_len=m_len, constant=constant, eps=eps)

    # TODO(synk): add an L-tile axis (re-using kv per L tile) and bf16 activation
    # streams for very long target sequences / v7x's smaller VMEM.
    return pl.pallas_call(
        kernel,
        out_shape=jax.ShapeDtypeStruct((L, B * G, 1, Wg), q.dtype),
        grid=(B, G, n_st),
        in_specs=[
            pl.BlockSpec((L, 1, 1, Wg),
                         lambda b, g, s, p=pq, o=sq, gg=G: (0, (b * p + o) * gg + g, 0, 0)),
            pl.BlockSpec((ts, 1, 1, Wg),
                         lambda b, g, s, p=pk, o=sk, gg=G: (s, (b * p + o) * gg + g, 0, 0)),
            pl.BlockSpec((ts, 1, 1, Wg),
                         lambda b, g, s, p=pv, o=sv, gg=G: (s, (b * p + o) * gg + g, 0, 0)),
        ],
        out_specs=pl.BlockSpec((L, 1, 1, Wg),
                               lambda b, g, s, gg=G: (0, b * gg + g, 0, 0)),
        scratch_shapes=[
            pltpu.VMEM((Hg, Dh, Dh), jnp.float32),   # kv_sin accumulator
            pltpu.VMEM((Hg, Dh, Dh), jnp.float32),   # kv_cos accumulator
            pltpu.VMEM((1, Wg), jnp.float32),        # ksum_sin accumulator
            pltpu.VMEM((1, Wg), jnp.float32),        # ksum_cos accumulator
        ],
        compiler_params=pltpu.CompilerParams(
            dimension_semantics=("parallel", "parallel", "arbitrary"),
            vmem_limit_bytes=_vmem_limit_bytes()),
    )(q, k, v)


# ----------------------------------------------------------------------------
# Module-level wrapper (mirrors CosformerAttention.forward, non-causal path)
# ----------------------------------------------------------------------------
class CosformerAttentionPallas:
    """Defaults covered: use_relu=True, causal=False, has_out=False, dropout=0."""
    # TODO(synk): causal (masked-bmm) branch, has_out/out_proj, key_padding_mask
    # and incremental decoding state are not implemented (defaults are covered).

    def __init__(self, embed_dim, num_heads, constant=1, key=None):
        self.embed_dim = embed_dim
        self.num_heads = num_heads
        self.head_dim = embed_dim // num_heads
        assert self.head_dim * num_heads == embed_dim
        self.constant = constant
        if key is None:
            key = jax.random.PRNGKey(0)
        kq, kk, kv_, kb = jax.random.split(key, 4)
        scale = 1.0 / math.sqrt(embed_dim)
        # Weights stored PRE-TRANSPOSED to (in, out): kernels never transpose.
        self.q_wt = jax.random.normal(kq, (embed_dim, embed_dim), jnp.float32) * scale
        self.k_wt = jax.random.normal(kk, (embed_dim, embed_dim), jnp.float32) * scale
        self.v_wt = jax.random.normal(kv_, (embed_dim, embed_dim), jnp.float32) * (scale / math.sqrt(2))
        b = jax.random.normal(kb, (3, embed_dim), jnp.float32) * 0.01
        self.q_b, self.k_b, self.v_b = b[0], b[1], b[2]
        # Fused (in, 3*out) weight/bias for the shared-input (self-attention) path.
        self.qkv_wt = jnp.concatenate([self.q_wt, self.k_wt, self.v_wt], axis=1)
        self.qkv_b = jnp.concatenate([self.q_b, self.k_b, self.v_b], axis=0)

    def __call__(self, query, key, value, eps=1e-4):
        # query: (L, B, E), key/value: (S, B, E)
        L, B, E = query.shape
        S = key.shape[0]
        H, Dh = self.num_heads, self.head_dim
        G = _num_head_groups(H, Dh)
        Wg = (H // G) * Dh

        if key is query and value is query:
            # Self-attention: fused QKV projection (x read once, wide lane-dense
            # output); the 4-D attention layout below is a free reshape of it.
            y = linear(query.reshape(L * B, E), self.qkv_wt, self.qkv_b)
            qkv = y.reshape(L, B * 3 * G, 1, Wg)
            q_arr = k_arr = v_arr = qkv
            slots, packs = (0, 1, 2), (3, 3, 3)
        else:
            q_arr = linear(query.reshape(L * B, E), self.q_wt, self.q_b
                           ).reshape(L, B * G, 1, Wg)
            k_arr = linear(key.reshape(S * B, E), self.k_wt, self.k_b
                           ).reshape(S, B * G, 1, Wg)
            v_arr = linear(value.reshape(S * B, E), self.v_wt, self.v_b
                           ).reshape(S, B * G, 1, Wg)
            slots, packs = (0, 0, 0), (1, 1, 1)

        out = cosformer_attention_core(q_arr, k_arr, v_arr, slots, packs, B, H, Dh,
                                       constant=self.constant, eps=eps)
        return out.reshape(L, B, E)   # free reshape back to (L, B, E)


# ----------------------------------------------------------------------------
# Pure-JAX reference (mirrors the torch math) for a sanity check
# ----------------------------------------------------------------------------
def reference_forward(mod, query, key, value, eps=1e-4):
    L, B, E = query.shape
    S = key.shape[0]
    H, Dh = mod.num_heads, mod.head_dim
    q = query.reshape(L * B, E) @ mod.q_wt + mod.q_b
    k = key.reshape(S * B, E) @ mod.k_wt + mod.k_b
    v = value.reshape(S * B, E) @ mod.v_wt + mod.v_b
    q = q.reshape(L, B * H, Dh).transpose(1, 0, 2)
    k = k.reshape(S, B * H, Dh).transpose(1, 0, 2)
    v = v.reshape(S, B * H, Dh).transpose(1, 0, 2)
    q = jnp.maximum(q, 0.0)
    k = jnp.maximum(k, 0.0)
    m = max(L, S)
    idx = (jnp.pi / 2.0) * jnp.arange(1, m + 1, dtype=jnp.float32) * float(mod.constant)
    ang = (idx / float(m)).reshape(1, m, 1)
    q_ = jnp.concatenate([q * jnp.sin(ang[:, :L]), q * jnp.cos(ang[:, :L])], axis=-1)
    k_ = jnp.concatenate([k * jnp.sin(ang[:, :S]), k * jnp.cos(ang[:, :S])], axis=-1)
    kv_ = jnp.einsum('nld,nlm->ndm', k_, v)
    z_ = 1.0 / jnp.maximum(jnp.einsum('nld,nd->nl', q_, jnp.sum(k_, axis=1)), eps)
    attn = jnp.einsum('nld,ndm,nl->nlm', q_, kv_, z_)
    return attn.transpose(1, 0, 2).reshape(L, B, E)


def _max_rel_err(a, b):
    return float(jnp.max(jnp.abs(a - b)) / (jnp.max(jnp.abs(b)) + 1e-6))


if __name__ == "__main__":
    embed_dim = 128
    num_heads = 4
    tgt_len = 8
    src_len = 640      # forces >1 S-tile (exercises the kv/ksum accumulator path)
    bsz = 2

    root = jax.random.PRNGKey(0)
    k_mod, k_q, k_k, k_v = jax.random.split(root, 4)
    mod = CosformerAttentionPallas(embed_dim, num_heads, constant=1, key=k_mod)

    # Path 1: self-attention (fused QKV projection, single S tile).
    x = jax.random.normal(k_q, (tgt_len, bsz, embed_dim), jnp.float32)
    out_self = jax.block_until_ready(mod(x, x, x))
    ref_self = reference_forward(mod, x, x, x)
    assert out_self.shape == (tgt_len, bsz, embed_dim)
    assert _max_rel_err(out_self, ref_self) < 2e-2, "self-attention mismatch"

    # Path 2: cross-attention (separate projections, multi-tile S accumulation).
    key_in = jax.random.normal(k_k, (src_len, bsz, embed_dim), jnp.float32)
    value_in = jax.random.normal(k_v, (src_len, bsz, embed_dim), jnp.float32)
    out_cross = jax.block_until_ready(mod(x, key_in, value_in))
    ref_cross = reference_forward(mod, x, key_in, value_in)
    assert out_cross.shape == (tgt_len, bsz, embed_dim)
    assert _max_rel_err(out_cross, ref_cross) < 2e-2, "cross-attention mismatch"

    print("KERNEL_OK")
</pallas_src>

<mosaic_0001>
module attributes {stable_mosaic.version = 11 : i64} {
  func.func @_linear_kernel(%arg0: i32, %arg1: i32, %arg2: memref<16x128xf32, #tpu.memory_space<vmem>>, %arg3: memref<128x384xf32, #tpu.memory_space<vmem>>, %arg4: memref<1x384xf32, #tpu.memory_space<vmem>>, %arg5: memref<16x384xf32, #tpu.memory_space<vmem>>) attributes {dimension_semantics = [#tpu.dimension_semantics<parallel>, #tpu.dimension_semantics<parallel>], iteration_bounds = array<i64: 1, 1>, scalar_prefetch = 0 : i64, scratch_operands = 0 : i64, tpu.core_type = #tpu.core_type<tc>, window_params = [{transform_indices = @transform_0, window_bounds = array<i64: 16, 128>}, {transform_indices = @transform_1, window_bounds = array<i64: 128, 384>}, {transform_indices = @transform_2, window_bounds = array<i64: 1, 384>}, {transform_indices = @transform_3, window_bounds = array<i64: 16, 384>}]} {
    %c0 = arith.constant 0 : index
    %c0_0 = arith.constant 0 : index
    %0 = vector.load %arg2[%c0, %c0_0] : memref<16x128xf32, #tpu.memory_space<vmem>>, vector<16x128xf32>
    %1 = arith.truncf %0 : vector<16x128xf32> to vector<16x128xbf16>
    %c0_1 = arith.constant 0 : index
    %c0_2 = arith.constant 0 : index
    %2 = vector.load %arg3[%c0_1, %c0_2] : memref<128x384xf32, #tpu.memory_space<vmem>>, vector<128x384xf32>
    %3 = arith.truncf %2 : vector<128x384xf32> to vector<128x384xbf16>
    %cst = arith.constant dense<0.000000e+00> : vector<16x384xf32>
    %4 = tpu.matmul %1, %3, %cst {dimension_numbers = #tpu.dot_dimension_numbers<[1], [0], [0], [1], [0, 0, 1, 1], [], []>} : vector<16x128xbf16>, vector<128x384xbf16>, vector<16x384xf32> -> vector<16x384xf32>
    %c0_3 = arith.constant 0 : index
    %c0_4 = arith.constant 0 : index
    %5 = vector.load %arg4[%c0_3, %c0_4] : memref<1x384xf32, #tpu.memory_space<vmem>>, vector<1x384xf32>
    %6 = vector.broadcast %5 : vector<1x384xf32> to vector<16x384xf32>
    %7 = arith.addf %4, %6 : vector<16x384xf32>
    %c0_5 = arith.constant 0 : index
    %c0_6 = arith.constant 0 : index
    %8 = vector.load %arg5[%c0_5, %c0_6] : memref<16x384xf32, #tpu.memory_space<vmem>>, vector<16x384xf32>
    tpu.vector_store %arg5[%c0_5, %c0_6], %7 {strides = array<i32>} : memref<16x384xf32, #tpu.memory_space<vmem>>, vector<16x384xf32>,
    return
  }
  func.func @transform_0(%arg0: i32, %arg1: i32) -> (i32, i32) {
    %c0_i32 = arith.constant 0 : i32
    %c0_i32_0 = arith.constant 0 : i32
    return %arg1, %c0_i32 : i32, i32
  }
  func.func @transform_1(%arg0: i32, %arg1: i32) -> (i32, i32) {
    %c0_i32 = arith.constant 0 : i32
    %c0_i32_0 = arith.constant 0 : i32
    return %c0_i32, %arg0 : i32, i32
  }
  func.func @transform_2(%arg0: i32, %arg1: i32) -> (i32, i32) {
    %c0_i32 = arith.constant 0 : i32
    %c0_i32_0 = arith.constant 0 : i32
    return %c0_i32, %arg0 : i32, i32
  }
  func.func @transform_3(%arg0: i32, %arg1: i32) -> (i32, i32) {
    %c0_i32 = arith.constant 0 : i32
    return %arg1, %arg0 : i32, i32
  }
}

</mosaic_0001>

<bundles_post_ra>
// kernel: tpu_custom_call.1
= control target key start
LH: loop header
LB: loop body
LE: loop exit
PB: predicated region body
PF: predicated region fallthrough
CT: control target
= control target key end

     0   :  { %8 = vsyncpa [#allocation3], 0  ;;  %s406_s0 = inlined_call_operand.hbm [shape: f32[16,128], index: 0, kind: input, shape index: {}]   ;;  %s407_s1 = inlined_call_operand.hbm [shape: f32[128,384], index: 1, kind: input, shape index: {}]   ;;  %s408_s2 = inlined_call_operand.vmem [shape: f32[1,384], index: 2, kind: input, shape index: {}]   ;;  %s409_s3 = inlined_call_operand.hbm [shape: f32[16,384], index: 3, kind: output, shape index: {}]  }
   0x1   :  { %9 = vsyncpa [#allocation6], 0 }
   0x2   :  { %10 = vsyncpa [#allocation4], 0  ;;  %s349_s12 = smov [#allocation2]  }
   0x3   :  { %s16_s13 = sshll.u32 %s349_s12, 4  ;;  %s17_s13 = int_to_ptr.vmem [resolvable:$true] %s16_s13 }
   0x4   :  { %s291_s14 = scalar_lea.vmem %s17_s13, 256  ;;  %p296_p1 = scmp.lt.s32.totalorder %s17_s13, %s17_s13 }
   0x5   :  { %p292_p0 = scmp.ne.s32.totalorder %s17_s13, %s291_s14  ;;  %p297_p2 = scmp.lt.s32.totalorder %s291_s14, %s291_s14 }
   0x7   :  { %p298_p3 = por %p297_p2, %p296_p1 }
   0x9   :  { %p299_p4 = pnand %p298_p3, %p292_p0 }
   0xb   :  { %302 = shalt.err (!%p299_p4)
}
   0xc   :  { %s350_s15 = smov 128   ;;  %s351_s16 = smov 8  }
   0xd   :  { %22 = dma.hbm_to_vmem [thread:$0]  %s406_s0, 256, %s17_s13, [#allocation3], %s350_s15, %s350_s15, %s351_s16  }
   0xe   :  { %s352_s19 = smov [#allocation5]  }
   0xf   :  { %s28_s20 = sshll.u32 %s352_s19, 4  ;;  %s29_s20 = int_to_ptr.vmem [resolvable:$true] %s28_s20 }
  0x10   :  { %s311_s21 = scalar_lea.vmem %s29_s20, 6144  ;;  %p316_p6 = scmp.lt.s32.totalorder %s29_s20, %s29_s20 }
  0x11   :  { %p312_p5 = scmp.ne.s32.totalorder %s29_s20, %s311_s21  ;;  %p317_p7 = scmp.lt.s32.totalorder %s311_s21, %s311_s21 }
  0x13   :  { %p318_p8 = por %p317_p7, %p316_p6 }
  0x15   :  { %p319_p9 = pnand %p318_p8, %p312_p5 }
  0x17   :  { %322 = shalt.err (!%p319_p9)
}
  0x18   :  { %s353_s22 = smov 384   ;;  %s354_s23 = smov 24  }
  0x19   :  { %34 = dma.hbm_to_vmem [thread:$0]  %s407_s1, 6144, %s29_s20, [#allocation6], %s353_s22, %s353_s22, %s354_s23  }
  0x1a   :  { %343 = dma.done.wait [#allocation3], 256  }
  0x1b   :  { %344 = vsyncadd [#allocation3], 4294967040 }
  0x1c   :  { %345 = dma.done.wait [#allocation6], 6144  }
  0x1d   :  { %346 = vsyncadd [#allocation6], 4294961152  ;;  %v355_v0 = vmov 0.0   ;;  %vm356_vm0 = vmmov 0   ;;  %v357_v1 = vmov 0   ;;  %v90_v2 = vld [vmem:[#allocation5 + $0x158] sm:$0xff] }
  0x1e   :  { %253 = vmatprep.subr.bf16.mxu1 %v355_v0  ;;  %269 = vmatprep.mubr.msk.bf16.mxu1 %vm356_vm0, %v355_v0  ;;  %v93_v3 = vld [vmem:[#allocation5 + $0x170] sm:$0xff]  ;;  %v91_v4 = vld [vmem:[#allocation5 + $0x160] sm:$0xff]  ;;  %v94_v6 = vld [vmem:[#allocation5 + $0x178] sm:$0xff]  ;;  %s358_s26 = smov [#allocation7]  }
  0x1f   :  { %168 = vmatprep.mubr.bf16.mxu0 %v357_v1  ;;  %v117_v5 = vpack.c.bf16 %v93_v3, %v90_v2  ;;  %v89_v7 = vld [vmem:[#allocation5 + $0x150] sm:$0xff]  ;;  %v92_v8 = vld [vmem:[#allocation5 + $0x168] sm:$0xff]  ;;  %v118_v9 = vpack.c.bf16 %v94_v6, %v91_v4  ;;  %v87_v12 = vld [vmem:[#allocation5 + $0x140] sm:$0xff]  ;;  %s231_s27 = sshll.u32 %s358_s26, 4  ;;  %s232_s27 = int_to_ptr.vmem [resolvable:$true] %s231_s27 }
  0x20   :  { %v116_v10 = vpack.c.bf16 %v92_v8, %v89_v7  ;;  %v84_v11 = vld [vmem:[#allocation5 + $0x128] sm:$0xff]  ;;  %v85_v13 = vld [vmem:[#allocation5 + $0x130] sm:$0xff]  ;;  %v83_v16 = vld [vmem:[#allocation5 + $0x120] sm:$0xff]  ;;  %p328_p11 = scmp.lt.s32.totalorder %s232_s27, %s232_s27 }
  0x21   :  { %136 = vmatprep.subr.bf16.mxu0 %v117_v5  ;;  %v114_v14 = vpack.c.bf16 %v87_v12, %v84_v11  ;;  %v88_v15 = vld [vmem:[#allocation5 + $0x148] sm:$0xff]  ;;  %v86_v17 = vld [vmem:[#allocation5 + $0x138] sm:$0xff]  ;;  %254 = vmatpush3.bf16.msra.mxu1 %v118_v9  ;;  %v81_v21 = vld [vmem:[#allocation5 + $0x110] sm:$0xff] }
  0x22   :  { %137 = vmatpush1.bf16.msra.mxu0 %v116_v10  ;;  %v115_v18 = vpack.c.bf16 %v88_v15, %v85_v13  ;;  %v113_v19 = vpack.c.bf16 %v86_v17, %v83_v16  ;;  %v78_v20 = vld [vmem:[#allocation5 + $0xf8] sm:$0xff]  ;;  %v79_v22 = vld [vmem:[#allocation5 + $0x100] sm:$0xff]  ;;  %255 = vmatprep.subr.bf16.mxu1 %v355_v0  ;;  %v77_v25 = vld [vmem:[#allocation5 + $0xf0] sm:$0xff] }
  0x23   :  { %138 = vmatprep.subr.bf16.mxu0 %v114_v14  ;;  %v111_v23 = vpack.c.bf16 %v81_v21, %v78_v20  ;;  %v82_v24 = vld [vmem:[#allocation5 + $0x118] sm:$0xff]  ;;  %v80_v26 = vld [vmem:[#allocation5 + $0x108] sm:$0xff]  ;;  %v75_v28 = vld [vmem:[#allocation5 + $0xe0] sm:$0xff]  ;;  %v121_v14 = vlaneseq }
  0x24   :  { %v72_v27 = vld [vmem:[#allocation5 + $0xc8] sm:$0xff]  ;;  %v112_v29 = vpack.c.bf16 %v82_v24, %v79_v22  ;;  %v110_v30 = vpack.c.bf16 %v80_v26, %v77_v25  ;;  %v73_v31 = vld [vmem:[#allocation5 + $0xd0] sm:$0xff]  ;;  %v71_v34 = vld [vmem:[#allocation5 + $0xc0] sm:$0xff] }
  0x25   :  { %256 = vmatpush3.bf16.msra.mxu1 %v115_v18  ;;  %v108_v32 = vpack.c.bf16 %v75_v28, %v72_v27  ;;  %v76_v33 = vld [vmem:[#allocation5 + $0xe8] sm:$0xff]  ;;  %v74_v35 = vld [vmem:[#allocation5 + $0xd8] sm:$0xff]  ;;  %v69_v37 = vld [vmem:[#allocation5 + $0xb0] sm:$0xff]  ;;  %v122_v15 = vshrl.u32 %v121_v14, 7 }
  0x26   :  { %139 = vmatpush1.bf16.msra.mxu0 %v113_v19  ;;  %257 = vmatprep.subr.bf16.mxu1 %v355_v0  ;;  %v66_v36 = vld [vmem:[#allocation5 + $0x98] sm:$0xff]  ;;  %v109_v38 = vpack.c.bf16 %v76_v33, %v73_v31  ;;  %v107_v39 = vpack.c.bf16 %v74_v35, %v71_v34  ;;  %v67_v40 = vld [vmem:[#allocation5 + $0xa0] sm:$0xff]  ;;  %v65_v43 = vld [vmem:[#allocation5 + $0x90] sm:$0xff] }
  0x27   :  { %140 = vmatprep.subr.bf16.mxu0 %v111_v23  ;;  %v105_v41 = vpack.c.bf16 %v69_v37, %v66_v36  ;;  %v70_v42 = vld [vmem:[#allocation5 + $0xb8] sm:$0xff]  ;;  %v68_v44 = vld [vmem:[#allocation5 + $0xa8] sm:$0xff]  ;;  %v63_v46 = vld [vmem:[#allocation5 + $0x80] sm:$0xff]  ;;  %v131_v16 = vsub.s32 2, %v122_v15  ;;  %v123_v17 = vsub.s32 0, %v122_v15  ;;  %v127_v19 = vsub.s32 1, %v122_v15 }
  0x28   :  { %v60_v45 = vld [vmem:[#allocation5 + $0x68] sm:$0xff]  ;;  %v106_v47 = vpack.c.bf16 %v70_v42, %v67_v40  ;;  %v104_v48 = vpack.c.bf16 %v68_v44, %v65_v43  ;;  %v61_v49 = vld [vmem:[#allocation5 + $0x70] sm:$0xff]  ;;  %v59_v52 = vld [vmem:[#allocation5 + $0x60] sm:$0xff] }
  0x29   :  { %258 = vmatpush3.bf16.msra.mxu1 %v112_v29  ;;  %v102_v50 = vpack.c.bf16 %v63_v46, %v60_v45  ;;  %v64_v51 = vld [vmem:[#allocation5 + $0x88] sm:$0xff]  ;;  %v62_v53 = vld [vmem:[#allocation5 + $0x78] sm:$0xff]  ;;  %v57_v55 = vld [vmem:[#allocation5 + $0x50] sm:$0xff] }
  0x2a   :  { %141 = vmatpush1.bf16.msra.mxu0 %v110_v30  ;;  %259 = vmatprep.subr.bf16.mxu1 %v355_v0  ;;  %v54_v54 = vld [vmem:[#allocation5 + $0x38] sm:$0xff]  ;;  %v103_v56 = vpack.c.bf16 %v64_v51, %v61_v49  ;;  %v101_v57 = vpack.c.bf16 %v62_v53, %v59_v52  ;;  %v55_v58 = vld [vmem:[#allocation5 + $0x40] sm:$0xff]  ;;  %v53_v61 = vld [vmem:[#allocation5 + $0x30] sm:$0xff] }
  0x2b   :  { %142 = vmatprep.subr.bf16.mxu0 %v108_v32  ;;  %v99_v59 = vpack.c.bf16 %v57_v55, %v54_v54  ;;  %v58_v60 = vld [vmem:[#allocation5 + $0x58] sm:$0xff]  ;;  %v56_v62 = vld [vmem:[#allocation5 + $0x48] sm:$0xff]  ;;  %v51_v1 = vld [vmem:[#allocation5 + $0x20] sm:$0xff] }
  0x2c   :  { %v48_v63 = vld [vmem:[#allocation5 + $0x8] sm:$0xff]  ;;  %v100_v2 = vpack.c.bf16 %v58_v60, %v55_v58  ;;  %v98_v3 = vpack.c.bf16 %v56_v62, %v53_v61  ;;  %v49_v4 = vld [vmem:[#allocation5 + $0x10] sm:$0xff]  ;;  %v47_v7 = vld [vmem:[#allocation5] sm:$0xff] }
  0x2d   :  { %260 = vmatpush3.bf16.msra.mxu1 %v109_v38  ;;  %v96_v5 = vpack.c.bf16 %v51_v1, %v48_v63  ;;  %v52_v6 = vld [vmem:[#allocation5 + $0x28] sm:$0xff]  ;;  %v50_v8 = vld [vmem:[#allocation5 + $0x18] sm:$0xff]  ;;  %v44_v11 = vld [vmem:[#allocation2] sm:$0xff] }
  0x2e   :  { %143 = vmatpush1.bf16.msra.mxu0 %v107_v39  ;;  %261 = vmatprep.subr.bf16.mxu1 %v355_v0  ;;  %v97_v9 = vpack.c.bf16 %v52_v6, %v49_v4  ;;  %v95_v10 = vpack.c.bf16 %v50_v8, %v47_v7  ;;  %v45_v12 = vld [vmem:[#allocation2 + $0x8] sm:$0xff]  ;;  %v119_v18 = vld [vmem:[%s408_s2] sm:$0x7]  ;;  %s323_s2 = scalar_lea.vmem %s232_s27, 768 }
  0x2f   :  { %144 = vmatprep.subr.bf16.mxu0 %v105_v41  ;;  %v46_v13 = vpack.c.bf16 %v45_v12, %v44_v11  ;;  %v132_v20 = vrot.slane %v119_v18, %v131_v16  ;;  %v124_v21 = vrot.slane %v119_v18, %v123_v17  ;;  %v128_v22 = vrot.slane %v119_v18, %v127_v19  ;;  %p324_p10 = scmp.ne.s32.totalorder %s232_s27, %s323_s2  ;;  %p329_p12 = scmp.lt.s32.totalorder %s323_s2, %s323_s2 }
  0x31   :  { %262 = vmatpush3.bf16.msra.mxu1 %v106_v47  ;;  %p330_p13 = por %p329_p12, %p328_p11 }
  0x32   :  { %145 = vmatpush1.bf16.msra.mxu0 %v104_v48  ;;  %263 = vmatprep.subr.bf16.mxu1 %v355_v0 }
  0x33   :  { %146 = vmatprep.subr.bf16.mxu0 %v102_v50  ;;  %p331_p0 = pnand %p330_p13, %p324_p10 }
  0x35   :  { %264 = vmatpush3.bf16.msra.mxu1 %v103_v56 }
  0x36   :  { %147 = vmatpush1.bf16.msra.mxu0 %v101_v57  ;;  %265 = vmatprep.subr.bf16.mxu1 %v355_v0 }
  0x37   :  { %148 = vmatprep.subr.bf16.mxu0 %v99_v59 }
  0x39   :  { %266 = vmatpush3.bf16.msra.mxu1 %v100_v2 }
  0x3a   :  { %149 = vmatpush1.bf16.msra.mxu0 %v98_v3  ;;  %267 = vmatprep.subr.bf16.mxu1 %v355_v0 }
  0x3b   :  { %150 = vmatprep.subr.bf16.mxu0 %v96_v5 }
  0x3d   :  { %268 = vmatpush3.bf16.msra.mxu1 %v97_v9 }
  0x3e   :  { %151 = vmatpush1.bf16.msra.mxu0 %v95_v10 }
  0x40   :  { %270 = vmatmul.mubr.bf16.vlgmr.msra.gmra.mxu1 %v46_v13 }
  0x41   :  { %169 = vmatmul.mubr.bf16.vlgmr.msra.gmra.mxu0 %v46_v13 }
 0x100   :  { %v213_v23 = vpop.f32.mrf.mxu1 }
 0x101   :  { %v170_v0 = vpop.f32.mrf.mxu0  ;;  %v214_v24 = vadd.f32 %v213_v23, %v132_v20 }
 0x102   :  { %v171_v25 = vadd.f32 %v170_v0, %v124_v21  ;;  %v271_v26 = vpop.f32.mrf.mxu1 }
 0x103   :  { %v172_v27 = vpop.f32.mrf.mxu0  ;;  %222 = vst [vmem:[#allocation7 + $0x10] sm:$0xff] %v214_v24 }
 0x104   :  { %220 = vst [vmem:[#allocation7] sm:$0xff] %v171_v25  ;;  %v173_v28 = vadd.f32 %v172_v27, %v128_v22  ;;  %v216_v29 = vpop.f32.mrf.mxu1 }
 0x105   :  { %v174_v30 = vpop.f32.mrf.mxu0  ;;  %v217_v31 = vadd.f32 %v216_v29, %v132_v20 }
 0x106   :  { %221 = vst [vmem:[#allocation7 + $0x8] sm:$0xff] %v173_v28  ;;  %v175_v32 = vadd.f32 %v174_v30, %v124_v21  ;;  %v272_v33 = vpop.f32.mrf.mxu1 }
 0x107   :  { %v176_v34 = vpop.f32.mrf.mxu0  ;;  %225 = vst [vmem:[#allocation7 + $0x28] sm:$0xff] %v217_v31 }
 0x108   :  { %223 = vst [vmem:[#allocation7 + $0x18] sm:$0xff] %v175_v32  ;;  %v177_v35 = vadd.f32 %v176_v34, %v128_v22 }
 0x10a   :  { %224 = vst [vmem:[#allocation7 + $0x20] sm:$0xff] %v177_v35 }
 0x10b   :  { %334 = shalt.err (!%p331_p0)
}
 0x10c   :  { %237 = dma.vmem_to_hbm [thread:$0]  %s232_s27, 768, %s409_s3, [#allocation4], %s353_s22, %s353_s22, %s354_s23  }
 0x10d   :  { %347 = dma.done.wait [#allocation4], 768  }
 0x10e   :  { %348 = vsyncadd [#allocation4], 4294966528 }
 0x10f   :  { %241 = vsyncpa [#allocation3], 1 }
 0x110   :  { %242 = vsyncpa [#allocation6], 1 }
 0x111   :  { %243 = vsyncpa [#allocation4], 1 }

</bundles_post_ra>
